<compile_context>
chip_gen: v7x
topology: tpu7x:2x2x1
jax: 0.10.0
libtpu: 0.0.40
codegen_flags: <defaults>
</compile_context>

<pallas_src>
import jax
import jax.numpy as jnp
from jax.experimental import pallas as pl
from jax.experimental.pallas import tpu as pltpu

HIDDEN = 768          # VideoMAE-base hidden size
NUM_CLASSES = 5       # len(train_ds.label2id) in the original module
LN_EPS = 1e-12        # VideoMAE config layer_norm_eps


# --------------------------------------------------------------------------
# 1) x.permute(0, 2, 1, 3, 4) — one grid step per batch element.
#    Input block  (D1, D2, H*W), output block (D2, D1, H*W); the d1<->d2
#    swap is done with a short static loop of strided slab copies (the lane
#    axis H*W is untouched, so no XLU lane transpose is generated).
# --------------------------------------------------------------------------
def _permute_copy_kernel(x_ref, o_ref):
    d1_extent = x_ref.shape[0]                       # channels: small (3)
    for d1 in range(d1_extent):                      # static unroll
        o_ref[:, d1, :] = x_ref[d1, :, :]            # (D2, HW) slab copy


def permute_02134(x, *, vmem_limit_bytes=64 * 1024 * 1024):
    """[B, D1, D2, H, W] -> [B, D2, D1, H, W] (e.g. [B,C,T,H,W]->[B,T,C,H,W])."""
    B, D1, D2, H, W = x.shape
    HW = H * W
    x4 = x.reshape(B, D1, D2, HW)                    # free: contiguous dims
    out4 = pl.pallas_call(
        _permute_copy_kernel,
        grid=(B,),
        in_specs=[pl.BlockSpec((None, D1, D2, HW),
                               lambda b: (b, 0, 0, 0))],
        out_specs=pl.BlockSpec((None, D2, D1, HW),
                               lambda b: (b, 0, 0, 0)),
        out_shape=jax.ShapeDtypeStruct((B, D2, D1, HW), x.dtype),
        compiler_params=pltpu.CompilerParams(
            dimension_semantics=("parallel",),
            vmem_limit_bytes=vmem_limit_bytes),
    )(x4)
    return out4.reshape(B, D2, D1, H, W)


# --------------------------------------------------------------------------
# 2) VideoMAE classification head: mean-pool over tokens -> LayerNorm
#    (fc_norm) -> Linear(768, num_classes) -> logits.
#    Grid: (batch "parallel", token-chunk "arbitrary"); [1, 768] f32
#    accumulator scratch; LN + MXU matmul only on the last chunk.
# --------------------------------------------------------------------------
def prepare_head_params(ln_gamma, ln_beta, cls_w, cls_b):
    """One-time (init/load-time) parameter prep: pad classes to a lane-dense
    128, pre-transpose weight to [768, Cpad], pre-cast it to bf16."""
    C, D = cls_w.shape
    c_pad = max(128, ((C + 127) // 128) * 128)
    wt_pad = jnp.zeros((D, c_pad), jnp.bfloat16).at[:, :C].set(
        cls_w.T.astype(jnp.bfloat16))
    b_pad = jnp.zeros((1, c_pad), jnp.float32).at[0, :C].set(
        cls_b.astype(jnp.float32))
    gamma2d = ln_gamma.reshape(1, D).astype(jnp.float32)
    beta2d = ln_beta.reshape(1, D).astype(jnp.float32)
    return (wt_pad, b_pad, gamma2d, beta2d, C)


def _make_head_kernel(total_s):
    inv_s = 1.0 / float(total_s)

    def kernel(feat_ref, gamma_ref, beta_ref, wt_ref, b_ref, out_ref, acc_ref):
        si = pl.program_id(1)

        @pl.when(si == 0)
        def _():
            acc_ref[...] = jnp.zeros_like(acc_ref)

        # Partial token sum for this chunk (f32).
        acc_ref[...] += jnp.sum(feat_ref[...].astype(jnp.float32),
                                axis=0, keepdims=True)            # [1, D]

        @pl.when(si == pl.num_programs(1) - 1)
        def _():
            pooled = acc_ref[...] * inv_s                          # [1, D] f32

            # fc_norm LayerNorm over the hidden (lane) axis, kept in f32.
            mu = jnp.mean(pooled, axis=-1, keepdims=True)
            centered = pooled - mu
            var = jnp.mean(centered * centered, axis=-1, keepdims=True)
            normed = centered * jax.lax.rsqrt(var + LN_EPS)
            normed = normed * gamma_ref[...] + beta_ref[...]       # [1, D]

            # Classifier: bf16 only at the MXU, f32 accumulation; weight is
            # already [D, Cpad] bf16 (no per-call relayout / cast).
            logits = jnp.dot(normed.astype(jnp.bfloat16), wt_ref[...],
                             preferred_element_type=jnp.float32)   # [1, Cpad]
            out_ref[...] = (logits + b_ref[...]).astype(out_ref.dtype)

    return kernel


def videomae_classifier_head(features, head_params, *, tile_s=None):
    """features [B, S, 768] -> logits [B, num_classes]."""
    B, S, D = features.shape
    wt_pad, b_pad, gamma2d, beta2d, num_classes = head_params
    c_pad = wt_pad.shape[1]

    if tile_s is None or S % tile_s != 0:
        tile_s = S
        for t in (512, 256, 128, 64, 32, 16, 8):      # multiple-of-8 divisor
            if S % t == 0:
                tile_s = t
                break

    logits = pl.pallas_call(
        _make_head_kernel(S),
        grid_spec=pltpu.PrefetchScalarGridSpec(
            num_scalar_prefetch=0,
            grid=(B, S // tile_s),
            in_specs=[
                pl.BlockSpec((None, tile_s, D), lambda b, s: (b, s, 0)),
                pl.BlockSpec((1, D), lambda b, s: (0, 0)),
                pl.BlockSpec((1, D), lambda b, s: (0, 0)),
                pl.BlockSpec((D, c_pad), lambda b, s: (0, 0)),
                pl.BlockSpec((1, c_pad), lambda b, s: (0, 0)),
            ],
            out_specs=pl.BlockSpec((1, c_pad), lambda b, s: (b, 0)),
            scratch_shapes=[pltpu.VMEM((1, D), jnp.float32)],
        ),
        out_shape=jax.ShapeDtypeStruct((B, c_pad), jnp.float32),
        compiler_params=pltpu.CompilerParams(
            dimension_semantics=("parallel", "arbitrary")),
    )(features, gamma2d, beta2d, wt_pad, b_pad)
    return logits[:, :num_classes]                     # drop padded classes


# --------------------------------------------------------------------------
# Pure-JAX reference for the self-test.
# --------------------------------------------------------------------------
def _head_reference(feat, gamma, beta, w, b):
    pooled = feat.mean(axis=1)
    mu = pooled.mean(axis=-1, keepdims=True)
    var = ((pooled - mu) ** 2).mean(axis=-1, keepdims=True)
    normed = (pooled - mu) / jnp.sqrt(var + LN_EPS) * gamma + beta
    return normed @ w.T + b


if __name__ == "__main__":
    key = jax.random.PRNGKey(0)
    kv, kf, kg, kb, kw, kc = jax.random.split(key, 6)

    # ---- stream dict input + permute(0, 2, 1, 3, 4), as in forward() ------
    B, C_in, T, H, W = 2, 3, 8, 16, 16
    x = {"inside": jax.random.normal(kv, (B, C_in, T, H, W), jnp.float32)}

    video = permute_02134(x["inside"])                 # [B, T, C, H, W]
    jax.block_until_ready(video)
    assert video.shape == (B, T, C_in, H, W)
    assert jnp.array_equal(video, jnp.transpose(x["inside"], (0, 2, 1, 3, 4)))

    # TODO(synk): VideoMAE tubelet-embedding + transformer encoder is an
    # external pretrained model (not translated); synthetic encoder features
    # stand in for its output here.
    S = 16
    feats = jax.random.normal(kf, (B, S, HIDDEN), jnp.float32)
    ln_gamma = 1.0 + 0.05 * jax.random.normal(kg, (HIDDEN,), jnp.float32)
    ln_beta = 0.05 * jax.random.normal(kb, (HIDDEN,), jnp.float32)
    cls_w = 0.02 * jax.random.normal(kw, (NUM_CLASSES, HIDDEN), jnp.float32)
    cls_b = 0.02 * jax.random.normal(kc, (NUM_CLASSES,), jnp.float32)

    # One-time parameter prep (padding / transpose / bf16 cast hoisted out of
    # the per-forward path).
    head_params = prepare_head_params(ln_gamma, ln_beta, cls_w, cls_b)
    head_params = jax.tree_util.tree_map(
        lambda a: jax.block_until_ready(a) if isinstance(a, jax.Array) else a,
        head_params)

    # tile_s=8 exercises the multi-chunk accumulator path (2 token chunks).
    logits = videomae_classifier_head(feats, head_params, tile_s=8)
    jax.block_until_ready(logits)

    ref = _head_reference(feats, ln_gamma, ln_beta, cls_w, cls_b)
    assert logits.shape == (B, NUM_CLASSES)
    assert jnp.allclose(logits, ref, atol=1e-2, rtol=1e-2), (
        jnp.max(jnp.abs(logits - ref)))

    print("KERNEL_OK")
</pallas_src>

<mosaic_0001>
module attributes {stable_mosaic.version = 11 : i64} {
  func.func @_permute_copy_kernel(%arg0: i32, %arg1: memref<1x3x8x256xf32, #tpu.memory_space<vmem>>, %arg2: memref<1x8x3x256xf32, #tpu.memory_space<vmem>>) attributes {dimension_semantics = [#tpu.dimension_semantics<parallel>], iteration_bounds = array<i64: 2>, scalar_prefetch = 0 : i64, scratch_operands = 0 : i64, tpu.core_type = #tpu.core_type<tc>, window_params = [{transform_indices = @transform_0, window_bounds = array<i64: 1, 3, 8, 256>}, {transform_indices = @transform_1, window_bounds = array<i64: 1, 8, 3, 256>}]} {
    %c0 = arith.constant 0 : index
    %c0_0 = arith.constant 0 : index
    %c0_1 = arith.constant 0 : index
    %c0_2 = arith.constant 0 : index
    %0 = vector.load %arg1[%c0, %c0_0, %c0_1, %c0_2] : memref<1x3x8x256xf32, #tpu.memory_space<vmem>>, vector<1x1x8x256xf32>
    %1 = vector.shape_cast %0 : vector<1x1x8x256xf32> to vector<8x256xf32>
    %c0_3 = arith.constant 0 : index
    %c0_4 = arith.constant 0 : index
    %c0_5 = arith.constant 0 : index
    %c0_6 = arith.constant 0 : index
    %2 = vector.load %arg2[%c0_3, %c0_4, %c0_5, %c0_6] : memref<1x8x3x256xf32, #tpu.memory_space<vmem>>, vector<1x8x1x256xf32>
    %3 = vector.shape_cast %2 : vector<1x8x1x256xf32> to vector<8x256xf32>
    %4 = vector.shape_cast %1 : vector<8x256xf32> to vector<1x8x1x256xf32>
    tpu.vector_store %arg2[%c0_3, %c0_4, %c0_5, %c0_6], %4 {strides = array<i32>} : memref<1x8x3x256xf32, #tpu.memory_space<vmem>>, vector<1x8x1x256xf32>,
    %c0_7 = arith.constant 0 : index
    %c1 = arith.constant 1 : index
    %c0_8 = arith.constant 0 : index
    %c0_9 = arith.constant 0 : index
    %5 = vector.load %arg1[%c0_7, %c1, %c0_8, %c0_9] : memref<1x3x8x256xf32, #tpu.memory_space<vmem>>, vector<1x1x8x256xf32>
    %6 = vector.shape_cast %5 : vector<1x1x8x256xf32> to vector<8x256xf32>
    %c0_10 = arith.constant 0 : index
    %c0_11 = arith.constant 0 : index
    %c1_12 = arith.constant 1 : index
    %c0_13 = arith.constant 0 : index
    %7 = vector.load %arg2[%c0_10, %c0_11, %c1_12, %c0_13] : memref<1x8x3x256xf32, #tpu.memory_space<vmem>>, vector<1x8x1x256xf32>
    %8 = vector.shape_cast %7 : vector<1x8x1x256xf32> to vector<8x256xf32>
    %9 = vector.shape_cast %6 : vector<8x256xf32> to vector<1x8x1x256xf32>
    tpu.vector_store %arg2[%c0_10, %c0_11, %c1_12, %c0_13], %9 {strides = array<i32>} : memref<1x8x3x256xf32, #tpu.memory_space<vmem>>, vector<1x8x1x256xf32>,
    %c0_14 = arith.constant 0 : index
    %c2 = arith.constant 2 : index
    %c0_15 = arith.constant 0 : index
    %c0_16 = arith.constant 0 : index
    %10 = vector.load %arg1[%c0_14, %c2, %c0_15, %c0_16] : memref<1x3x8x256xf32, #tpu.memory_space<vmem>>, vector<1x1x8x256xf32>
    %11 = vector.shape_cast %10 : vector<1x1x8x256xf32> to vector<8x256xf32>
    %c0_17 = arith.constant 0 : index
    %c0_18 = arith.constant 0 : index
    %c2_19 = arith.constant 2 : index
    %c0_20 = arith.constant 0 : index
    %12 = vector.load %arg2[%c0_17, %c0_18, %c2_19, %c0_20] : memref<1x8x3x256xf32, #tpu.memory_space<vmem>>, vector<1x8x1x256xf32>
    %13 = vector.shape_cast %12 : vector<1x8x1x256xf32> to vector<8x256xf32>
    %14 = vector.shape_cast %11 : vector<8x256xf32> to vector<1x8x1x256xf32>
    tpu.vector_store %arg2[%c0_17, %c0_18, %c2_19, %c0_20], %14 {strides = array<i32>} : memref<1x8x3x256xf32, #tpu.memory_space<vmem>>, vector<1x8x1x256xf32>,
    return
  }
  func.func @transform_0(%arg0: i32) -> (i32, i32, i32, i32) {
    %c0_i32 = arith.constant 0 : i32
    %c0_i32_0 = arith.constant 0 : i32
    %c0_i32_1 = arith.constant 0 : i32
    %c0_i32_2 = arith.constant 0 : i32
    return %arg0, %c0_i32, %c0_i32_0, %c0_i32_1 : i32, i32, i32, i32
  }
  func.func @transform_1(%arg0: i32) -> (i32, i32, i32, i32) {
    %c0_i32 = arith.constant 0 : i32
    %c0_i32_0 = arith.constant 0 : i32
    %c0_i32_1 = arith.constant 0 : i32
    %c0_i32_2 = arith.constant 0 : i32
    return %arg0, %c0_i32, %c0_i32_0, %c0_i32_1 : i32, i32, i32, i32
  }
}

</mosaic_0001>

<bundles_post_ra>
// kernel: tpu_custom_call.1
= control target key start
LH: loop header
LB: loop body
LE: loop exit
PB: predicated region body
PF: predicated region fallthrough
CT: control target
= control target key end

     0   :  { %6 = vsyncpa [#allocation3], 0  ;;  %s931_s0 = inlined_call_operand.hbm [shape: f32[2,3,8,256], index: 0, kind: input, shape index: {}]   ;;  %s932_s1 = inlined_call_operand.hbm [shape: f32[2,8,3,256], index: 1, kind: output, shape index: {}]  }
   0x1   :  { %8 = vsyncpa [#allocation3 + $0x1], 0 }
   0x2   :  { %9 = vsyncpa [#allocation4], 0 }
   0x3   :  { %11 = vsyncpa [#allocation4 + $0x1], 0  ;;  %s675_s6 = smov 0   ;;  %s677_s7 = smov 0  }
   0x4   :  { %s679_s8 = smov 0   ;;  %s681_s9 = smov 0  }
   0x5 LB: > { %s696_s10 = sadd.s32 4294967295, %s656_s9   ;;  %s461_s11 = sadd.s32 4294967294, %s656_s9   ;;  %s656_s9 = sphi %s681_s9, %s946_s9   ;;  %s652_s8 = sphi %s679_s8, %s945_s8   ;;  %s648_s7 = sphi %s677_s7, %s944_s7   ;;  %s644_s6 = sphi %s675_s6, %s943_s6  }
   0x6   : > { %s700_s12 = sadd.s32 1, %s656_s9   ;;  %s24_s13 = sadd.s32 1, %s652_s8 }
   0x7   : > { %s21_s14 = ssub.s32 %s656_s9, %s700_s12  ;;  %p31_p0 = scmp.ne.s32.totalorder %s652_s8, %s648_s7 }
   0x8   : > { %p22_p1 = scmp.eq.s32.totalorder %s21_s14, 0  ;;  %p32_p2 = scmp.eq.s32.totalorder %s656_s9, 0 }
   0x9   : > { %p37_p3 = scmp.ne.s32.totalorder %s648_s7, %s644_s6  ;;  %p38_p4 = scmp.eq.s32.totalorder %s696_s10, 0 }
   0xa   : > { %s712_s15 = scalar_select %p22_p1, %s652_s8, %s24_s13  }
   0xb   : > { %p33_p5 = por %p32_p2, %p31_p0  ;;  %p714_p6 = por %p38_p4, %p37_p3 }
   0xc   : > { %p61_p7 = scmp.eq.s32.totalorder %s696_s10, 1  ;;  %p67_p8 = scmp.eq.s32.totalorder %s461_s11, 1 }
   0xd   : > { %p515_p10 = scmp.lt.s32.totalorder %s656_s9, 2  ;;  %s87_s19 = sand.u32 1, %s652_s8  }
   0xe   : > { %p721_p11 = por %p61_p7, %p31_p0  ;;  %p725_p12 = por %p67_p8, %p37_p3 }
   0xf   : > { %s501_s20 = smul.u32 768, %s656_s9  ;;  %p736_p13 = pnand %p515_p10, %p33_p5 }
  0x10   : > { %s935_s17 = scalar_select %p721_p11, 1, 0 }
  0x11   : > { %s936_s18 = scalar_select %p725_p12, 1, 0 }
  0x12   : > { %s500_s21 = smul.u32 48, %s87_s19  ;;  %s734_s24 = scalar_lea.hbm %s931_s0, %s501_s20 }
  0x13   : > { %s742_s28 = scalar_lea.sflag [#allocation3], %s87_s19  ;;  %s560_s29 = scalar_lea.hbm %s734_s24, 768 }
  0x14   : > { %s91_s26 = scalar_lea.vmem [#allocation2], %s500_s21  ;;  %p561_p0 = scmp.ne.s32.totalorder %s734_s24, %s560_s29 }
  0x15   : > { %s98_s27 = sshll.u32 %s91_s26, 4  ;;  %p562_p1 = pneg %p736_p13  ;;  %s740_s27 = int_to_ptr.vmem [resolvable:$true] %s98_s27 }
  0x16   : > { %s565_s3 = scalar_lea.hbm %s931_s0, 1536  ;;  %p566_p4 = scmp.lt.u32.totalorder %s734_s24, %s931_s0 }
  0x17   : > { %p563_p2 = pnand %p562_p1, %p561_p0  ;;  %p567_p5 = scmp.lt.u32.totalorder %s565_s3, %s560_s29 }
  0x18   : > { %p569_p8 = scmp.lt.u32.totalorder %s560_s29, %s734_s24 }
  0x19   : > { %p564_p3 = pneg %p563_p2  ;;  %p568_p7 = por %p567_p5, %p566_p4 }
  0x1b   : > { %p570_p10 = por %p569_p8, %p568_p7 }
  0x1d   : > { %p571_p9 = pnand %p570_p10, %p564_p3 }
  0x1f   : > { %574 = shalt.err (!%p571_p9)
}
  0x20   : > { %s575_s11 = scalar_lea.vmem %s740_s27, 768  ;;  %s658_s13 = smov [#allocation2]  }
  0x21   : > { %p576_p0 = scmp.ne.s32.totalorder %s740_s27, %s575_s11  ;;  %s580_s14 = sshll.u32 %s658_s13, 4  ;;  %s581_s14 = int_to_ptr.vmem [resolvable:$false] %s580_s14 }
  0x22   : > { %s582_s19 = scalar_lea.vmem %s581_s14, 1536  ;;  %p583_p11 = scmp.lt.s32.totalorder %s740_s27, %s581_s14 }
  0x23   : > { %p578_p2 = pnand %p576_p0, %p562_p1  ;;  %p584_p4 = scmp.lt.s32.totalorder %s582_s19, %s575_s11 }
  0x25   : > { %p579_p12 = pneg %p578_p2  ;;  %p585_p5 = por %p584_p4, %p583_p11 }
  0x27   : > { %p586_p7 = pnand %p585_p5, %p579_p12 }
  0x29   : > { %589 = shalt.err (!%p586_p7)
}
  0x2a   : > { %s659_s20 = smov 256   ;;  %s660_s21 = smov 16  }
  0x2b   : > { %510 = dma.hbm_to_vmem [thread:$0]  (!%p736_p13), %s734_s24, 768, %s740_s27, %s742_s28, %s659_s20, %s659_s20, %s660_s21  }
  0x2c   : > { %p465_p9 = scmp.ge.s32.totalorder %s656_s9, 1  ;;  %p106_p1 = scmp.lt.s32.totalorder %s656_s9, 3 }
  0x2e   : > { %p107_p3 = pnand %p465_p9, %p106_p1 }
  0x2f   : > { %s773_s22 = sand.u32 (!%p107_p3), 1, %s648_s7  }
  0x30   : > { %110 = sbr.rel (%p107_p3) target bundleno = 93 (0x5d), region = 24  ;;  %s113_s26 = scalar_lea.sflag (!%p107_p3), [#allocation3], %s773_s22 }
  0x31   : > { %s502_s23 = smul.u32 (!%p107_p3), 48, %s773_s22 }
  0x33   : > { %s116_s29 = scalar_lea.vmem (!%p107_p3), [#allocation2], %s502_s23 }
  0x37   : > { %635 = dma.done.wait (%p714_p6), %s113_s26, 768  }
  0x38   : > { %637 = vsyncadd (%p714_p6), %s113_s26, 4294966528  ;;  %v144_v0 = vlaneseq  ;;  %v661_v1 = vmov 1966171168   ;;  %s466_s24 = sshll.u32 %s773_s22, 6  ;;  %v135_v6 = vld [vmem:[%s116_s29] sm:$0xff]  ;;  %v136_v7 = vld [vmem:[%s116_s29 + $0x8] sm:$0xff] }
  0x39   : > { %v142_v2 = vunpack.c.l.s4 %v661_v1  ;;  %v554_v8 = vld [vmem:[%s116_s29] ss:$8 sps:$4 sm:$0xff]   ;;  %v140_v9 = vcombine.high %v135_v6, %v136_v7  ;;  %v474_v10 = vld [vmem:[%s116_s29 + $0x10] sm:$0xff]  ;;  %v475_v11 = vld [vmem:[%s116_s29 + $0x18] sm:$0xff]  ;;  %s796_s16 = scalar_lea.vmem [#allocation5], %s466_s24  ;;  %s499_s25 = sshll.u32 %s696_s10, 10 }
  0x3a   : > { %v145_v3 = vshrl.u32 %v144_v0, 7  ;;  %v556_v12 = vld [vmem:[%s116_s29 + $0x10] ss:$8 sps:$4 sm:$0xff]   ;;  %v222_v14 = vcombine.high %v474_v10, %v475_v11  ;;  %v484_v15 = vld [vmem:[%s116_s29 + $0x20] sm:$0xff]  ;;  %v485_v16 = vld [vmem:[%s116_s29 + $0x28] sm:$0xff]  ;;  %vm785_vm0 = vcmp.lt.s32.totalorder %v144_v0, 256  ;;  %s873_s30 = scalar_lea.hbm %s932_s1, %s499_s25 }
  0x3b   : > { %v143_v4 = vunpack.c.0.s8 %v142_v2  ;;  %v558_v17 = vld [vmem:[%s116_s29 + $0x20] ss:$8 sps:$4 sm:$0xff]   ;;  %v301_v21 = vcombine.high %v484_v15, %v485_v16  ;;  %s388_s27 = sshll.u32 %s796_s16, 4  ;;  %s375_s2 = scalar_lea.sflag [#allocation4], %s773_s22  ;;  %s875_s27 = int_to_ptr.vmem [resolvable:$true] %s388_s27 }
  0x3c   : > { %s590_s3 = scalar_lea.vmem %s875_s27, 1024  ;;  %p940_p11 = scmp.ne.s32.totalorder %s935_s17, 0 }
  0x3d   : > { %v781_v5 = vsub.s32 %v143_v4, %v145_v3  ;;  %p591_p6 = scmp.ne.s32.totalorder %s875_s27, %s590_s3  ;;  %s662_s4 = smov [#allocation5]  }
  0x3e   : > { %s594_s5 = sshll.u32 %s662_s4, 4  ;;  %s595_s5 = int_to_ptr.vmem [resolvable:$false] %s594_s5 }
  0x3f   : > { %v147_v13 = vrot.slane %v554_v8, %v781_v5  ;;  %v154_v19 = vrot.slane %v140_v9, %v781_v5  ;;  %v229_v20 = vrot.slane %v556_v12, %v781_v5  ;;  %v236_v24 = vrot.slane %v222_v14, %v781_v5  ;;  %p592_p12 = pnand %p591_p6, %p940_p11  ;;  %s596_s11 = scalar_lea.vmem %s595_s5, 2048 }
  0x40   : > { %v308_v25 = vrot.slane %v558_v17, %v781_v5  ;;  %v315_v45 = vrot.slane %v301_v21, %v781_v5  ;;  %p597_p8 = scmp.lt.s32.totalorder %s875_s27, %s595_s5  ;;  %p598_p10 = scmp.lt.s32.totalorder %s596_s11, %s590_s3 }
  0x41   : > { %v163_v22 = vrot.slane %v147_v13, %v781_v5  ;;  %v155_v23 = vcombine.high %v147_v13, %v147_v13  ;;  %v170_v26 = vrot.slane %v154_v19, %v781_v5  ;;  %v156_v27 = vcombine.high %v154_v19, %v154_v19  ;;  %p593_p13 = pneg %p592_p12 }
  0x42   : > { %v245_v28 = vrot.slane %v229_v20, %v781_v5  ;;  %v237_v29 = vcombine.high %v229_v20, %v229_v20  ;;  %v252_v32 = vrot.slane %v236_v24, %v781_v5  ;;  %v238_v33 = vcombine.high %v236_v24, %v236_v24  ;;  %p599_p0 = por %p598_p10, %p597_p8 }
  0x43   : > { %201 = vst.msk [vmem:[%s796_s16] ss:$4 sm:$0x3] %vm785_vm0, %v163_v22  ;;  %v177_v30 = vrot.slane %v155_v23, %v781_v5  ;;  %v185_v31 = vcombine.high %v163_v22, %v163_v22  ;;  %470 = vst.msk [vmem:[%s796_s16 + $0x20] ss:$4 sm:$0x3] %vm785_vm0, %v170_v26  ;;  %v184_v34 = vrot.slane %v156_v27, %v781_v5 }
  0x44   : > { %v186_v35 = vcombine.high %v170_v26, %v170_v26  ;;  %476 = vst.msk [vmem:[%s796_s16 + $0x1] ss:$4 sm:$0x3] %vm785_vm0, %v245_v28  ;;  %v259_v36 = vrot.slane %v237_v29, %v781_v5  ;;  %v267_v37 = vcombine.high %v245_v28, %v245_v28  ;;  %480 = vst.msk [vmem:[%s796_s16 + $0x21] ss:$4 sm:$0x3] %vm785_vm0, %v252_v32  ;;  %p600_p2 = pnand %p599_p0, %p593_p13 }
  0x45   : > { %467 = vst.msk [vmem:[%s796_s16 + $0x8] ss:$4 sm:$0x3] %vm785_vm0, %v177_v30  ;;  %468 = vst.msk [vmem:[%s796_s16 + $0x10] ss:$4 sm:$0x3] %vm785_vm0, %v185_v31  ;;  %v187_v38 = vcombine.high %v177_v30, %v177_v30  ;;  %v266_v39 = vrot.slane %v238_v33, %v781_v5  ;;  %v268_v40 = vcombine.high %v252_v32, %v252_v32 }
  0x46   : > { %v324_v41 = vrot.slane %v308_v25, %v781_v5  ;;  %471 = vst.msk [vmem:[%s796_s16 + $0x28] ss:$4 sm:$0x3] %vm785_vm0, %v184_v34  ;;  %472 = vst.msk [vmem:[%s796_s16 + $0x30] ss:$4 sm:$0x3] %vm785_vm0, %v186_v35  ;;  %v188_v42 = vcombine.high %v184_v34, %v184_v34  ;;  %v269_v43 = vcombine.high %v259_v36, %v259_v36 }
  0x47   : > { %477 = vst.msk [vmem:[%s796_s16 + $0x9] ss:$4 sm:$0x3] %vm785_vm0, %v259_v36  ;;  %478 = vst.msk [vmem:[%s796_s16 + $0x11] ss:$4 sm:$0x3] %vm785_vm0, %v267_v37  ;;  %v316_v44 = vcombine.high %v308_v25, %v308_v25  ;;  %v270_v46 = vcombine.high %v266_v39, %v266_v39  ;;  %v331_v49 = vrot.slane %v315_v45, %v781_v5 }
  0x48   : > { %469 = vst.msk [vmem:[%s796_s16 + $0x18] ss:$4 sm:$0x3] %vm785_vm0, %v187_v38  ;;  %481 = vst.msk [vmem:[%s796_s16 + $0x29] ss:$4 sm:$0x3] %vm785_vm0, %v266_v39  ;;  %v346_v47 = vcombine.high %v324_v41, %v324_v41  ;;  %v317_v50 = vcombine.high %v315_v45, %v315_v45 }
  0x49   : > { %482 = vst.msk [vmem:[%s796_s16 + $0x31] ss:$4 sm:$0x3] %vm785_vm0, %v268_v40  ;;  %486 = vst.msk [vmem:[%s796_s16 + $0x2] ss:$4 sm:$0x3] %vm785_vm0, %v324_v41  ;;  %v338_v48 = vrot.slane %v316_v44, %v781_v5  ;;  %v347_v53 = vcombine.high %v331_v49, %v331_v49 }
  0x4a   : > { %473 = vst.msk [vmem:[%s796_s16 + $0x38] ss:$4 sm:$0x3] %vm785_vm0, %v188_v42  ;;  %479 = vst.msk [vmem:[%s796_s16 + $0x19] ss:$4 sm:$0x3] %vm785_vm0, %v269_v43  ;;  %v345_v52 = vrot.slane %v317_v50, %v781_v5 }
  0x4b   : > { %483 = vst.msk [vmem:[%s796_s16 + $0x39] ss:$4 sm:$0x3] %vm785_vm0, %v270_v46  ;;  %488 = vst.msk [vmem:[%s796_s16 + $0x12] ss:$4 sm:$0x3] %vm785_vm0, %v346_v47  ;;  %v348_v51 = vcombine.high %v338_v48, %v338_v48 }
  0x4c   : > { %487 = vst.msk [vmem:[%s796_s16 + $0xa] ss:$4 sm:$0x3] %vm785_vm0, %v338_v48  ;;  %490 = vst.msk [vmem:[%s796_s16 + $0x22] ss:$4 sm:$0x3] %vm785_vm0, %v331_v49  ;;  %v349_v54 = vcombine.high %v345_v52, %v345_v52 }
  0x4d   : > { %489 = vst.msk [vmem:[%s796_s16 + $0x1a] ss:$4 sm:$0x3] %vm785_vm0, %v348_v51  ;;  %491 = vst.msk [vmem:[%s796_s16 + $0x2a] ss:$4 sm:$0x3] %vm785_vm0, %v345_v52 }
  0x4e   : > { %492 = vst.msk [vmem:[%s796_s16 + $0x32] ss:$4 sm:$0x3] %vm785_vm0, %v347_v53  ;;  %493 = vst.msk [vmem:[%s796_s16 + $0x3a] ss:$4 sm:$0x3] %vm785_vm0, %v349_v54 }
  0x4f   : > { %603 = shalt.err (!%p600_p2)
}
  0x50   : > { %s604_s13 = scalar_lea.hbm %s873_s30, 1024  ;;  %s608_s20 = scalar_lea.hbm %s932_s1, 2048 }
  0x51   : > { %p605_p4 = scmp.ne.s32.totalorder %s873_s30, %s604_s13  ;;  %p609_p9 = scmp.lt.u32.totalorder %s873_s30, %s932_s1 }
  0x52   : > { %p610_p1 = scmp.lt.u32.totalorder %s608_s20, %s604_s13  ;;  %p612_p6 = scmp.lt.u32.totalorder %s604_s13, %s873_s30 }
  0x53   : > { %p606_p5 = pnand %p605_p4, %p940_p11 }
  0x54   : > { %p611_p3 = por %p610_p1, %p609_p9 }
  0x55   : > { %p607_p7 = pneg %p606_p5 }
  0x56   : > { %p613_p12 = por %p612_p6, %p611_p3 }
  0x58   : > { %p614_p13 = pnand %p613_p12, %p607_p7 }
  0x5a   : > { %617 = shalt.err (!%p614_p13)
}
  0x5b   : > { %s663_s26 = smov 128   ;;  %s664_s29 = smov 8  }
  0x5c   : > { %505 = dma.vmem_to_hbm [thread:$0]  (%p940_p11), %s875_s27, 1024, %s873_s30, %s375_s2, %s663_s26, %s663_s26, %s664_s29  }
  0x5d PF: > { %s403_s24 = sand.u32 1, %s644_s6   ;;  %p941_p8 = scmp.ne.s32.totalorder %s936_s18, 0 }
  0x5e   : > { %p942_p10 = scmp.ge.s32.totalorder %s656_s9, 2  ;;  %s404_s16 = scalar_lea.sflag [#allocation4], %s403_s24 }
  0x60   : > { %p512_p0 = pnand %p942_p10, %p941_p8 }
  0x62   : > { %639 = dma.done.wait (!%p512_p0), %s404_s16, 1024  }
  0x63   : > { %641 = vsyncadd (!%p512_p0), %s404_s16, 4294966272  ;;  %p14_p2 = scmp.ge.s32.totalorder %s700_s12, 4   ;;  %s943_s6 = smov %s648_s7 }
  0x64   : > { %s944_s7 = smov %s652_s8  ;;  %s945_s8 = smov %s712_s15 }
  0x65   : > { %s946_s9 = smov %s700_s12  ;;  %16 = sbr.rel (!%p14_p2) target bundleno = 5 (0x5), region = 94 }
  0x6c   :  { %409 = vsyncpa [#allocation3], 1 }
  0x6d   :  { %411 = vsyncpa [#allocation3 + $0x1], 1 }
  0x6e   :  { %412 = vsyncpa [#allocation4], 1 }
  0x6f   :  { %414 = vsyncpa [#allocation4 + $0x1], 1 }

</bundles_post_ra>
